<compile_context>
chip_gen: v7x
topology: tpu7x:2x2x1
jax: 0.10.0
libtpu: 0.0.40
codegen_flags: <defaults>
</compile_context>

<pallas_src>
import numpy as np

import jax
import jax.numpy as jnp
from jax.experimental import pallas as pl
from jax.experimental.pallas import tpu as pltpu

WINDOW_SIZES = (1, 2, 3, 4)
NEG_SLOPE = 0.01          # F.leaky_relu default
NEG_INF = -1e30           # additive pool mask at invalid sequence positions
LANES = 128               # lane-dense padded widths


def _leaky(x, slope=NEG_SLOPE):
    return jnp.where(x >= 0, x, slope * x)


def _softmax_last(x):
    m = jnp.max(x, axis=-1, keepdims=True)
    e = jnp.exp(x - m)
    return e / jnp.sum(e, axis=-1, keepdims=True)   # exact normalization


def _round_up(v, m):
    return -(-v // m) * m


def _make_kernel(n_heads):
    """n_heads = 2 + domain_num (class logits + domain logits lane widths)."""

    def kernel(x_ref, wconv_ref, fcw_ref, whd_ref, bm_ref, bias_ref, out_ref):
        n, f = x_ref.shape                  # n = tile_b * s_pad flattened rows
        four_c = wconv_ref.shape[1]
        s_pad = bm_ref.shape[0]
        tb = n // s_pad
        hpad = fcw_ref.shape[1]
        ow = out_ref.shape[1]
        n_taps = wconv_ref.shape[0] // f    # = max(WINDOW_SIZES)

        # ---- tap-shifted copies of the NARROW input, lane-concatenated -----
        # xs[:, k*F:(k+1)*F][r] == x[r + k].  Rows that wrap past a batch/seq
        # boundary only feed positions bm_ref masks out: any valid position j
        # (j <= s - ksz) with tap k < ksz satisfies j + k < s <= s_pad.
        x = x_ref[...].astype(jnp.float32)
        taps = [x] + [pltpu.roll(x, shift=n - k, axis=0)
                      for k in range(1, n_taps)]
        xs = jnp.concatenate(taps, axis=-1).astype(wconv_ref.dtype)  # (n, 4F)

        # ---- ALL windows & taps in one K=4*F MXU matmul ---------------------
        conv = jnp.dot(xs, wconv_ref[...], preferred_element_type=jnp.float32)

        # ---- bias + additive validity mask, leaky_relu, max-pool over seq ---
        conv3 = conv.reshape(tb, s_pad, four_c)     # s_pad % 8 == 0 (host pad)
        act3 = _leaky(conv3 + bm_ref[...][None, :, :])
        pooled = jnp.max(act3, axis=1)              # (tb, 4C)

        # ---- fc1 (lane-dense: fcw padded to 128 output lanes) ---------------
        hid = _leaky(
            jnp.dot(pooled, fcw_ref[...], preferred_element_type=jnp.float32)
            + bias_ref[0:1, 0:hpad])                # (tb, hpad)

        # ---- class head + algebraically-folded domain head, one matmul ------
        combo = (jnp.dot(hid, whd_ref[...], preferred_element_type=jnp.float32)
                 + bias_ref[1:2, 0:ow])             # (tb, ow) lane-dense

        probs_c = _softmax_last(combo[:, 0:2])
        probs_d = _softmax_last(combo[:, 2:n_heads])

        # ---- one lane-dense (tb, 128) store; wrapper slices the heads -------
        parts = [probs_c, probs_d]
        pad_w = ow - n_heads
        if pad_w:
            parts.append(jnp.zeros((tb, pad_w), jnp.float32))
        out_ref[...] = jnp.concatenate(parts, axis=-1)

    return kernel


def cnn_fusion_forward(text, D, params, *, use_bf16=False, tile_b_max=128,
                       vmem_budget_bytes=20 << 20):
    """CNN_Fusion.forward(text, D).  D is unused by the PyTorch forward()."""
    del D
    b, s, f_in_dim = text.shape
    c = params["w1"].shape[-1]            # filter_num
    h_dim = params["fcw"].shape[-1]       # emb_dim
    dn = params["dw2"].shape[-1]          # domain_num
    nw = len(WINDOW_SIZES)
    kmax = max(WINDOW_SIZES)
    if s < kmax:
        raise ValueError(f"sequence length {s} < largest conv window {kmax}")

    s_pad = _round_up(s, 8)               # layout-clean in-kernel reshape
    out_w = _round_up(2 + dn, LANES)
    hpad = _round_up(h_dim, LANES)
    bias_w = max(hpad, out_w)

    # ---- host-side weight fusion -------------------------------------------
    # fused conv weight: block (tap k, window w) = W_w[k], zero when k >= ksz.
    rows = []
    for k in range(kmax):
        blk = [params[f"w{w + 1}"][k] if k < ksz
               else jnp.zeros((f_in_dim, c), jnp.float32)
               for w, ksz in enumerate(WINDOW_SIZES)]
        rows.append(jnp.concatenate(blk, axis=1))
    w_fused = jnp.concatenate(rows, axis=0)              # (kmax*F, 4*C)

    # conv bias + pool-validity mask baked into one additive (s_pad, 4C) const.
    bm_np = np.full((s_pad, nw * c), NEG_INF, np.float32)
    for w, ksz in enumerate(WINDOW_SIZES):
        valid = s - ksz + 1                               # >= 1 (checked above)
        bm_np[:valid, w * c:(w + 1) * c] = np.asarray(
            params[f"b{w + 1}"], np.float32).reshape(1, c)
    bm = jnp.asarray(bm_np)

    # fc1 weight, padded to a lane-dense 128-wide output (extra lanes are 0).
    fcw2 = jnp.pad(params["fcw"].reshape(nw * c, h_dim),
                   ((0, 0), (0, hpad - h_dim)))           # (4C, hpad)

    # class head + folded domain head:  logits_d = hid @ (dw1@dw2) + (db1@dw2
    # + db2)  (GRL and LeakyReLU(True) are identity in forward -> exact fold).
    whd = jnp.concatenate([params["cw"], params["dw1"] @ params["dw2"]],
                          axis=1)                         # (H, 2+dn)
    whd = jnp.pad(whd, ((0, hpad - h_dim), (0, out_w - (2 + dn))))
    hb = jnp.concatenate(
        [params["cb"], params["db1"] @ params["dw2"] + params["db2"]], axis=1)

    def _pad_row(v, w):
        v = v.reshape(1, -1)
        return jnp.pad(v, ((0, 0), (0, w - v.shape[1])))

    biases = jnp.concatenate([_pad_row(params["fcb"], bias_w),
                              _pad_row(hb, bias_w)], axis=0)   # (2, bias_w)

    # ---- batch tiling: VMEM-budgeted, >=2 grid steps for v7x megacore ------
    in_bytes = 2 if use_bf16 else 4
    if b <= 8:
        tile_b = b                                        # single tiny step
    else:
        # rough live bytes per flattened (b,s) row inside the kernel:
        # x f32 copy + xs (kmax*F) + conv/act (2 * 4C) + double-buffered input.
        per_row = (4 * ((1 + kmax) * f_in_dim + 2 * nw * c)
                   + 2 * in_bytes * f_in_dim)
        budget_rows = int(vmem_budget_bytes // (per_row * s_pad))
        tile_b = max(8, min(tile_b_max, (budget_rows // 8) * 8))
        tile_b = min(tile_b, _round_up(-(-b // 2), 8))    # >=2 steps (v7x 2 TC)
    nb = -(-b // tile_b)
    b_pad = nb * tile_b

    text_in = text.astype(jnp.bfloat16) if use_bf16 else text
    if use_bf16:
        w_fused = w_fused.astype(jnp.bfloat16)            # f32 accum in-kernel
    if b_pad != b or s_pad != s:
        text_in = jnp.pad(text_in, ((0, b_pad - b), (0, s_pad - s), (0, 0)))
    text_flat = text_in.reshape(b_pad * s_pad, f_in_dim)  # pre-flattened

    flops = (2 * b_pad * s_pad * (kmax * f_in_dim) * (nw * c)
             + 2 * b_pad * (nw * c * hpad + hpad * out_w))
    bytes_accessed = (int(text_flat.size) * text_flat.dtype.itemsize
                      + int(w_fused.size) * w_fused.dtype.itemsize
                      + 4 * int(fcw2.size + whd.size + bm.size + biases.size)
                      + 4 * b_pad * out_w)
    cost = pl.CostEstimate(flops=int(flops),
                           transcendentals=int(b_pad * (2 + dn)),
                           bytes_accessed=int(bytes_accessed))

    def _full(arr):
        nd = arr.ndim
        return pl.BlockSpec(arr.shape, lambda i: (0,) * nd)

    out = pl.pallas_call(
        _make_kernel(2 + dn),
        out_shape=jax.ShapeDtypeStruct((b_pad, out_w), jnp.float32),
        grid=(nb,),
        in_specs=[pl.BlockSpec((tile_b * s_pad, f_in_dim), lambda i: (i, 0)),
                  _full(w_fused), _full(fcw2), _full(whd), _full(bm),
                  _full(biases)],
        out_specs=pl.BlockSpec((tile_b, out_w), lambda i: (i, 0)),
        compiler_params=pltpu.CompilerParams(
            dimension_semantics=("parallel",),
            vmem_limit_bytes=48 * 1024 * 1024),    # safe on v5e/v6e/v7x
        cost_estimate=cost,
    )(text_flat, w_fused, fcw2, whd, bm, biases)

    return out[:b, 0:2], out[:b, 2:2 + dn]


def reference_forward(text, params):
    """Pure-JAX reference (same math / param layout as the PyTorch module)."""
    B, S, F = text.shape
    feats = []
    for idx, K in enumerate(WINDOW_SIZES):
        W = params[f"w{idx + 1}"]          # (K, F, C)
        bb = params[f"b{idx + 1}"]         # (1, C)
        L = S - K + 1
        acc = jnp.zeros((B, L, W.shape[-1]), jnp.float32)
        for k in range(K):
            acc = acc + jnp.einsum("bsf,fc->bsc", text[:, k:k + L, :], W[k])
        acc = jax.nn.leaky_relu(acc + bb, NEG_SLOPE)
        feats.append(jnp.max(acc, axis=1))
    feat = jnp.stack(feats, axis=1)        # (B, 4, C)
    h = jnp.einsum("bkc,kch->bh", feat, params["fcw"]) + params["fcb"]
    h = jax.nn.leaky_relu(h, NEG_SLOPE)
    class_out = jax.nn.softmax(h @ params["cw"] + params["cb"], axis=1)
    d = h @ params["dw1"] + params["db1"]  # LeakyReLU(True) == identity
    domain_out = jax.nn.softmax(d @ params["dw2"] + params["db2"], axis=1)
    return class_out, domain_out


def init_params(key, f_in, filter_num, emb_dim, domain_num):
    ks = jax.random.split(key, 16)
    p = {}
    for idx, K in enumerate(WINDOW_SIZES):
        p[f"w{idx + 1}"] = 0.1 * jax.random.normal(
            ks[idx], (K, f_in, filter_num), jnp.float32)
        p[f"b{idx + 1}"] = 0.1 * jax.random.normal(
            ks[4 + idx], (1, filter_num), jnp.float32)
    p["fcw"] = 0.1 * jax.random.normal(ks[8], (len(WINDOW_SIZES), filter_num,
                                               emb_dim), jnp.float32)
    p["fcb"] = 0.1 * jax.random.normal(ks[9], (1, emb_dim), jnp.float32)
    p["cw"] = 0.1 * jax.random.normal(ks[10], (emb_dim, 2), jnp.float32)
    p["cb"] = 0.1 * jax.random.normal(ks[11], (1, 2), jnp.float32)
    p["dw1"] = 0.1 * jax.random.normal(ks[12], (emb_dim, emb_dim), jnp.float32)
    p["db1"] = 0.1 * jax.random.normal(ks[13], (1, emb_dim), jnp.float32)
    p["dw2"] = 0.1 * jax.random.normal(ks[14], (emb_dim, domain_num),
                                       jnp.float32)
    p["db2"] = 0.1 * jax.random.normal(ks[15], (1, domain_num), jnp.float32)
    return p


if __name__ == "__main__":
    # Small shapes consistent with the module:
    B, S = 2, 8                  # batch, sequence length
    f_in = 32                    # per-token feature width (conv kernel width)
    filter_num = 16
    emb_dim = 32
    domain_num = 3

    key = jax.random.PRNGKey(0)
    k_text, k_param, k_dom = jax.random.split(key, 3)

    text = jax.random.normal(k_text, (B, S, f_in), jnp.float32)
    D = jax.random.randint(k_dom, (B,), 0, domain_num)   # unused in forward
    params = init_params(k_param, f_in, filter_num, emb_dim, domain_num)

    ref_class, ref_domain = reference_forward(text, params)

    # f32 path (default): tight tolerance.
    class_out, domain_out = cnn_fusion_forward(text, D, params)
    jax.block_until_ready((class_out, domain_out))
    np.testing.assert_allclose(np.asarray(class_out), np.asarray(ref_class),
                               rtol=5e-3, atol=5e-3)
    np.testing.assert_allclose(np.asarray(domain_out), np.asarray(ref_domain),
                               rtol=5e-3, atol=5e-3)
    assert class_out.shape == (B, 2) and domain_out.shape == (B, domain_num)

    # bf16 matmul-input path (recommended on v6e/v7x; f32 accumulation).
    class_bf, domain_bf = cnn_fusion_forward(text, D, params, use_bf16=True)
    jax.block_until_ready((class_bf, domain_bf))
    np.testing.assert_allclose(np.asarray(class_bf), np.asarray(ref_class),
                               rtol=3e-2, atol=3e-2)
    np.testing.assert_allclose(np.asarray(domain_bf), np.asarray(ref_domain),
                               rtol=3e-2, atol=3e-2)

    print("KERNEL_OK")
</pallas_src>

<mosaic_0001>
module attributes {stable_mosaic.version = 11 : i64} {
  func.func @kernel(%arg0: i32, %arg1: memref<16x32xf32, #tpu.memory_space<vmem>>, %arg2: memref<128x64xf32, #tpu.memory_space<vmem>>, %arg3: memref<64x128xf32, #tpu.memory_space<vmem>>, %arg4: memref<128x128xf32, #tpu.memory_space<vmem>>, %arg5: memref<8x64xf32, #tpu.memory_space<vmem>>, %arg6: memref<2x128xf32, #tpu.memory_space<vmem>>, %arg7: memref<2x128xf32, #tpu.memory_space<vmem>>) attributes {dimension_semantics = [#tpu.dimension_semantics<parallel>], iteration_bounds = array<i64: 1>, scalar_prefetch = 0 : i64, scratch_operands = 0 : i64, tpu.core_type = #tpu.core_type<tc>, window_params = [{transform_indices = @transform_0, window_bounds = array<i64: 16, 32>}, {pipeline_mode = #tpu.pipeline_mode<synchronous>, transform_indices = @transform_1, window_bounds = array<i64: 128, 64>}, {pipeline_mode = #tpu.pipeline_mode<synchronous>, transform_indices = @transform_2, window_bounds = array<i64: 64, 128>}, {pipeline_mode = #tpu.pipeline_mode<synchronous>, transform_indices = @transform_3, window_bounds = array<i64: 128, 128>}, {pipeline_mode = #tpu.pipeline_mode<synchronous>, transform_indices = @transform_4, window_bounds = array<i64: 8, 64>}, {pipeline_mode = #tpu.pipeline_mode<synchronous>, transform_indices = @transform_5, window_bounds = array<i64: 2, 128>}, {transform_indices = @transform_6, window_bounds = array<i64: 2, 128>}]} {
    %c0 = arith.constant 0 : index
    %c0_0 = arith.constant 0 : index
    %0 = vector.load %arg1[%c0, %c0_0] : memref<16x32xf32, #tpu.memory_space<vmem>>, vector<16x32xf32>
    %c15_i32 = arith.constant 15 : i32
    %1 = tpu.dynamic_rotate %0 by %c15_i32 dim 0 : vector<16x32xf32>, i32 -> vector<16x32xf32>
    %c14_i32 = arith.constant 14 : i32
    %2 = tpu.dynamic_rotate %0 by %c14_i32 dim 0 : vector<16x32xf32>, i32 -> vector<16x32xf32>
    %c13_i32 = arith.constant 13 : i32
    %3 = tpu.dynamic_rotate %0 by %c13_i32 dim 0 : vector<16x32xf32>, i32 -> vector<16x32xf32>
    %4 = tpu.concatenate %0, %1, %2, %3 in 1 : vector<16x32xf32>, vector<16x32xf32>, vector<16x32xf32>, vector<16x32xf32> -> vector<16x128xf32>
    %c0_1 = arith.constant 0 : index
    %c0_2 = arith.constant 0 : index
    %5 = vector.load %arg2[%c0_1, %c0_2] : memref<128x64xf32, #tpu.memory_space<vmem>>, vector<128x64xf32>
    %cst = arith.constant dense<0.000000e+00> : vector<16x64xf32>
    %6 = tpu.matmul %4, %5, %cst {dimension_numbers = #tpu.dot_dimension_numbers<[1], [0], [0], [1], [0, 0, 1, 1], [], []>} : vector<16x128xf32>, vector<128x64xf32>, vector<16x64xf32> -> vector<16x64xf32>
    %7 = vector.shape_cast %6 : vector<16x64xf32> to vector<2x8x64xf32>
    %c0_3 = arith.constant 0 : index
    %c0_4 = arith.constant 0 : index
    %8 = vector.load %arg5[%c0_3, %c0_4] : memref<8x64xf32, #tpu.memory_space<vmem>>, vector<8x64xf32>
    %9 = vector.shape_cast %8 : vector<8x64xf32> to vector<1x8x64xf32>
    %10 = vector.broadcast %9 : vector<1x8x64xf32> to vector<2x8x64xf32>
    %11 = arith.addf %7, %10 : vector<2x8x64xf32>
    %cst_5 = arith.constant 0.000000e+00 : f32
    %12 = vector.broadcast %cst_5 : f32 to vector<2x8x64xf32>
    %13 = arith.cmpf oge, %11, %12 : vector<2x8x64xf32>
    %cst_6 = arith.constant 0.00999999977 : f32
    %14 = vector.broadcast %cst_6 : f32 to vector<2x8x64xf32>
    %15 = arith.mulf %14, %11 : vector<2x8x64xf32>
    %16 = arith.select %13, %11, %15 : vector<2x8x64xi1>, vector<2x8x64xf32>
    %cst_7 = arith.constant dense<0xFF800000> : vector<2x64xf32>
    %17 = vector.multi_reduction <maximumf>, %16, %cst_7 [1] : vector<2x8x64xf32> to vector<2x64xf32>
    %c0_8 = arith.constant 0 : index
    %c0_9 = arith.constant 0 : index
    %18 = vector.load %arg3[%c0_8, %c0_9] : memref<64x128xf32, #tpu.memory_space<vmem>>, vector<64x128xf32>
    %cst_10 = arith.constant dense<0.000000e+00> : vector<2x128xf32>
    %19 = tpu.matmul %17, %18, %cst_10 {dimension_numbers = #tpu.dot_dimension_numbers<[1], [0], [0], [1], [0, 0, 1, 1], [], []>} : vector<2x64xf32>, vector<64x128xf32>, vector<2x128xf32> -> vector<2x128xf32>
    %c0_11 = arith.constant 0 : index
    %c0_12 = arith.constant 0 : index
    %20 = vector.load %arg6[%c0_11, %c0_12] : memref<2x128xf32, #tpu.memory_space<vmem>>, vector<1x128xf32>
    %21 = vector.broadcast %20 : vector<1x128xf32> to vector<2x128xf32>
    %22 = arith.addf %19, %21 : vector<2x128xf32>
    %cst_13 = arith.constant 0.000000e+00 : f32
    %23 = vector.broadcast %cst_13 : f32 to vector<2x128xf32>
    %24 = arith.cmpf oge, %22, %23 : vector<2x128xf32>
    %cst_14 = arith.constant 0.00999999977 : f32
    %25 = vector.broadcast %cst_14 : f32 to vector<2x128xf32>
    %26 = arith.mulf %25, %22 : vector<2x128xf32>
    %27 = arith.select %24, %22, %26 : vector<2x128xi1>, vector<2x128xf32>
    %c0_15 = arith.constant 0 : index
    %c0_16 = arith.constant 0 : index
    %28 = vector.load %arg4[%c0_15, %c0_16] : memref<128x128xf32, #tpu.memory_space<vmem>>, vector<128x128xf32>
    %cst_17 = arith.constant dense<0.000000e+00> : vector<2x128xf32>
    %29 = tpu.matmul %27, %28, %cst_17 {dimension_numbers = #tpu.dot_dimension_numbers<[1], [0], [0], [1], [0, 0, 1, 1], [], []>} : vector<2x128xf32>, vector<128x128xf32>, vector<2x128xf32> -> vector<2x128xf32>
    %c1 = arith.constant 1 : index
    %c0_18 = arith.constant 0 : index
    %30 = vector.load %arg6[%c1, %c0_18] : memref<2x128xf32, #tpu.memory_space<vmem>>, vector<1x128xf32>
    %31 = vector.broadcast %30 : vector<1x128xf32> to vector<2x128xf32>
    %32 = arith.addf %29, %31 : vector<2x128xf32>
    %33 = vector.extract_strided_slice %32 {offsets = [0, 0], sizes = [2, 2], strides = [1, 1]} : vector<2x128xf32> to vector<2x2xf32>
    %cst_19 = arith.constant dense<0xFF800000> : vector<2xf32>
    %34 = vector.multi_reduction <maximumf>, %33, %cst_19 [1] : vector<2x2xf32> to vector<2xf32>
    %35 = vector.shape_cast %34 : vector<2xf32> to vector<2x1xf32>
    %36 = vector.broadcast %35 : vector<2x1xf32> to vector<2x2xf32>
    %37 = arith.subf %33, %36 : vector<2x2xf32>
    %38 = math.exp %37 : vector<2x2xf32>
    %cst_20 = arith.constant dense<0.000000e+00> : vector<2xf32>
    %39 = vector.multi_reduction <add>, %38, %cst_20 [1] : vector<2x2xf32> to vector<2xf32>
    %40 = vector.shape_cast %39 : vector<2xf32> to vector<2x1xf32>
    %41 = vector.broadcast %40 : vector<2x1xf32> to vector<2x2xf32>
    %42 = arith.divf %38, %41 : vector<2x2xf32>
    %43 = vector.extract_strided_slice %32 {offsets = [0, 2], sizes = [2, 3], strides = [1, 1]} : vector<2x128xf32> to vector<2x3xf32>
    %cst_21 = arith.constant dense<0xFF800000> : vector<2xf32>
    %44 = vector.multi_reduction <maximumf>, %43, %cst_21 [1] : vector<2x3xf32> to vector<2xf32>
    %45 = vector.shape_cast %44 : vector<2xf32> to vector<2x1xf32>
    %46 = vector.broadcast %45 : vector<2x1xf32> to vector<2x3xf32>
    %47 = arith.subf %43, %46 : vector<2x3xf32>
    %48 = math.exp %47 : vector<2x3xf32>
    %cst_22 = arith.constant dense<0.000000e+00> : vector<2xf32>
    %49 = vector.multi_reduction <add>, %48, %cst_22 [1] : vector<2x3xf32> to vector<2xf32>
    %50 = vector.shape_cast %49 : vector<2xf32> to vector<2x1xf32>
    %51 = vector.broadcast %50 : vector<2x1xf32> to vector<2x3xf32>
    %52 = arith.divf %48, %51 : vector<2x3xf32>
    %cst_23 = arith.constant 0.000000e+00 : f32
    %53 = vector.broadcast %cst_23 : f32 to vector<2x123xf32>
    %54 = tpu.concatenate %42, %52, %53 in 1 : vector<2x2xf32>, vector<2x3xf32>, vector<2x123xf32> -> vector<2x128xf32>
    %c0_24 = arith.constant 0 : index
    %c0_25 = arith.constant 0 : index
    %55 = vector.load %arg7[%c0_24, %c0_25] : memref<2x128xf32, #tpu.memory_space<vmem>>, vector<2x128xf32>
    tpu.vector_store %arg7[%c0_24, %c0_25], %54 {strides = array<i32>} : memref<2x128xf32, #tpu.memory_space<vmem>>, vector<2x128xf32>,
    return
  }
  func.func @transform_0(%arg0: i32) -> (i32, i32) {
    %c0_i32 = arith.constant 0 : i32
    %c0_i32_0 = arith.constant 0 : i32
    return %arg0, %c0_i32 : i32, i32
  }
  func.func @transform_1(%arg0: i32) -> (i32, i32) {
    %c0_i32 = arith.constant 0 : i32
    %c0_i32_0 = arith.constant 0 : i32
    %c0_i32_1 = arith.constant 0 : i32
    return %c0_i32, %c0_i32_0 : i32, i32
  }
  func.func @transform_2(%arg0: i32) -> (i32, i32) {
    %c0_i32 = arith.constant 0 : i32
    %c0_i32_0 = arith.constant 0 : i32
    %c0_i32_1 = arith.constant 0 : i32
    return %c0_i32, %c0_i32_0 : i32, i32
  }
  func.func @transform_3(%arg0: i32) -> (i32, i32) {
    %c0_i32 = arith.constant 0 : i32
    %c0_i32_0 = arith.constant 0 : i32
    %c0_i32_1 = arith.constant 0 : i32
    return %c0_i32, %c0_i32_0 : i32, i32
  }
  func.func @transform_4(%arg0: i32) -> (i32, i32) {
    %c0_i32 = arith.constant 0 : i32
    %c0_i32_0 = arith.constant 0 : i32
    %c0_i32_1 = arith.constant 0 : i32
    return %c0_i32, %c0_i32_0 : i32, i32
  }
  func.func @transform_5(%arg0: i32) -> (i32, i32) {
    %c0_i32 = arith.constant 0 : i32
    %c0_i32_0 = arith.constant 0 : i32
    %c0_i32_1 = arith.constant 0 : i32
    return %c0_i32, %c0_i32_0 : i32, i32
  }
  func.func @transform_6(%arg0: i32) -> (i32, i32) {
    %c0_i32 = arith.constant 0 : i32
    %c0_i32_0 = arith.constant 0 : i32
    return %arg0, %c0_i32 : i32, i32
  }
}

</mosaic_0001>

<bundles_post_ra>
// kernel: tpu_custom_call.1
= control target key start
LH: loop header
LB: loop body
LE: loop exit
PB: predicated region body
PF: predicated region fallthrough
CT: control target
= control target key end

     0   :  { %11 = vsyncpa [#allocation3], 0  ;;  %s958_s0 = inlined_call_operand.hbm [shape: f32[16,32], index: 0, kind: input, shape index: {}]   ;;  %s959_s1 = inlined_call_operand.vmem [shape: f32[128,64], index: 1, kind: input, shape index: {}]   ;;  %s960_s2 = inlined_call_operand.vmem [shape: f32[64,128], index: 2, kind: input, shape index: {}]   ;;  %s961_s3 = inlined_call_operand.vmem [shape: f32[128,128], index: 3, kind: input, shape index: {}]   ;;  %s962_s4 = inlined_call_operand.vmem [shape: f32[8,64], index: 4, kind: input, shape index: {}]   ;;  %s963_s5 = inlined_call_operand.vmem [shape: f32[2,128], index: 5, kind: input, shape index: {}]   ;;  %s964_s6 = inlined_call_operand.hbm [shape: f32[2,128], index: 6, kind: output, shape index: {}]  }
   0x1   :  { %12 = vsyncpa [#allocation4], 0  ;;  %s722_s21 = smov [#allocation2]   ;;  %s674_s25 = scalar_lea.hbm %s958_s0, 256 }
   0x2   :  { %s18_s22 = sshll.u32 %s722_s21, 4  ;;  %p675_p0 = scmp.ne.s32.totalorder %s958_s0, %s674_s25  ;;  %s19_s22 = int_to_ptr.vmem [resolvable:$true] %s18_s22 }
   0x3   :  { %p678_p1 = scmp.lt.u32.totalorder %s674_s25, %s958_s0 }
   0x5   :  { %p680_p2 = pnand %p678_p1, %p675_p0 }
   0x7   :  { %683 = shalt.err (!%p680_p2)
}
   0x8   :  { %s684_s30 = scalar_lea.vmem %s19_s22, 256  ;;  %p689_p4 = scmp.lt.s32.totalorder %s19_s22, %s19_s22 }
   0x9   :  { %p685_p3 = scmp.ne.s32.totalorder %s19_s22, %s684_s30  ;;  %p690_p5 = scmp.lt.s32.totalorder %s684_s30, %s684_s30 }
   0xb   :  { %p691_p6 = por %p690_p5, %p689_p4 }
   0xd   :  { %p692_p7 = pnand %p691_p6, %p685_p3 }
   0xf   :  { %695 = shalt.err (!%p692_p7)
}
  0x10   :  { %s723_s7 = smov 128   ;;  %s724_s8 = smov 8  }
  0x11   :  { %24 = dma.hbm_to_vmem [thread:$0]  %s958_s0, 256, %s19_s22, [#allocation3], %s723_s7, %s723_s7, %s724_s8  }
  0x12   :  { %718 = dma.done.wait [#allocation3], 256  }
  0x13   :  { %719 = vsyncadd [#allocation3], 4294967040  ;;  %v42_v0 = vlaneseq  ;;  %v780_v2 = vld [vmem:[#allocation2] sm:$0xff]  ;;  %v782_v3 = vld [vmem:[#allocation2 + $0x8] sm:$0xff]  ;;  %s725_s22 = smov 32   ;;  %s726_s23 = smov 96  }
  0x14   :  { %v90_v4 = vld [vmem:[%s959_s1] sm:$0xff]  ;;  %v40_v5 = vrot.slane %v780_v2, 1  ;;  %v41_v6 = vrot.slane %v782_v3, 1  ;;  %v47_v7 = vrot.slane %v780_v2, 2  ;;  %v48_v8 = vrot.slane %v782_v3, 2  ;;  %v91_v9 = vld [vmem:[%s959_s1 + $0x8] sm:$0xff] }
  0x15   :  { %v43_v1 = vshrl.u32 %v42_v0, 7  ;;  %v52_v10 = vrot.slane %v780_v2, 3  ;;  %v53_v11 = vrot.slane %v782_v3, 3  ;;  %v572_v12 = vpack.c.bf16 %v91_v9, %v90_v4  ;;  %v92_v13 = vld [vmem:[%s959_s1 + $0x10] sm:$0xff]  ;;  %v93_v14 = vld [vmem:[%s959_s1 + $0x18] sm:$0xff]  ;;  %v94_v19 = vld [vmem:[%s959_s1 + $0x20] sm:$0xff] }
  0x16   :  { %v95_v20 = vld [vmem:[%s959_s1 + $0x28] sm:$0xff]  ;;  %v576_v25 = vpack.c.bf16 %v93_v14, %v92_v13  ;;  %v96_v28 = vld [vmem:[%s959_s1 + $0x30] sm:$0xff]  ;;  %v97_v29 = vld [vmem:[%s959_s1 + $0x38] sm:$0xff]  ;;  %s727_s28 = smov 64   ;;  %vm81_vm3 = vcmask 261120   ;;  %vm84_vm4 = vcmask 523264  }
  0x17   :  { %vm44_vm0 = vcmp.lt.s32.totalorder %v43_v1, 7  ;;  %vm49_vm1 = vcmp.lt.s32.totalorder %v43_v1, 6  ;;  %vm54_vm2 = vcmp.lt.s32.totalorder %v43_v1, 5  ;;  %573 = vmatprep.subr.bf16.mxu0 %v572_v12  ;;  %v580_v27 = vpack.c.bf16 %v95_v20, %v94_v19  ;;  %v98_v31 = vld [vmem:[%s959_s1 + $0x40] sm:$0xff]  ;;  %v99_v32 = vld [vmem:[%s959_s1 + $0x48] sm:$0xff]  ;;  %v100_v34 = vld [vmem:[%s959_s1 + $0x50] sm:$0xff] }
  0x18   :  { %v45_v15 = vsel %vm44_vm0, %v40_v5, %v41_v6  ;;  %v46_v16 = vsel %vm44_vm0, %v41_v6, %v40_v5  ;;  %v50_v17 = vsel %vm49_vm1, %v47_v7, %v48_v8  ;;  %v51_v18 = vsel %vm49_vm1, %v48_v8, %v47_v7  ;;  %575 = vmatpush3.bf16.msra.mxu0 %v572_v12  ;;  %v101_v35 = vld [vmem:[%s959_s1 + $0x58] sm:$0xff]  ;;  %v102_v37 = vld [vmem:[%s959_s1 + $0x60] sm:$0xff]  ;;  %v103_v38 = vld [vmem:[%s959_s1 + $0x68] sm:$0xff] }
  0x19   :  { %v651_v21 = vpack.i.bf16 %v46_v16, %v45_v15  ;;  %v55_v22 = vsel %vm54_vm2, %v52_v10, %v53_v11  ;;  %v56_v23 = vsel %vm54_vm2, %v53_v11, %v52_v10  ;;  %v656_v26 = vpack.i.bf16 %v51_v18, %v50_v17  ;;  %577 = vmatprep.subr.bf16.mxu0 %v576_v25  ;;  %v104_v40 = vld [vmem:[%s959_s1 + $0x70] sm:$0xff]  ;;  %v105_v41 = vld [vmem:[%s959_s1 + $0x78] sm:$0xff]  ;;  %v204_v58 = vld [vmem:[%s960_s2] sm:$0xff] }
  0x1a   :  { %v661_v24 = vpack.i.bf16 %v56_v23, %v55_v22  ;;  %v584_v30 = vpack.c.bf16 %v97_v29, %v96_v28  ;;  %v588_v33 = vpack.c.bf16 %v99_v32, %v98_v31  ;;  %v592_v36 = vpack.c.bf16 %v101_v35, %v100_v34  ;;  %v205_v59 = vld [vmem:[%s960_s2 + $0x8] sm:$0xff]  ;;  %v206_v62 = vld [vmem:[%s960_s2 + $0x10] sm:$0xff]  ;;  %v207_v63 = vld [vmem:[%s960_s2 + $0x18] sm:$0xff] }
  0x1b   :  { %652 = vrot.lane.b32.xlu0 %v651_v21, %s725_s22  ;;  %v596_v39 = vpack.c.bf16 %v103_v38, %v102_v37  ;;  %v600_v42 = vpack.c.bf16 %v105_v41, %v104_v40  ;;  %vm87_vm5 = vcmask 785408   ;;  %v605_v60 = vpack.c.bf16 %v205_v59, %v204_v58  ;;  %v208_v1 = vld [vmem:[%s960_s2 + $0x20] sm:$0xff]  ;;  %v210_v4 = vld [vmem:[%s960_s2 + $0x30] sm:$0xff]  ;;  %v211_v5 = vld [vmem:[%s960_s2 + $0x38] sm:$0xff] }
  0x1c   :  { %662 = vrot.lane.b32.xlu1 %v661_v24, %s726_s23  ;;  %579 = vmatpush3.bf16.msra.mxu0 %v576_v25  ;;  %v728_v61 = vmov 0.0|0.0   ;;  %v608_v0 = vpack.c.bf16 %v207_v63, %v206_v62  ;;  %v614_v6 = vpack.c.bf16 %v211_v5, %v210_v4  ;;  %vm729_vm6 = vmmov 0   ;;  %v181_v8 = vld [vmem:[%s962_s4] sm:$0xff]  ;;  %v297_v29 = vld [vmem:[%s961_s3 + $0x8] sm:$0xff]  ;;  %v298_v34 = vld [vmem:[%s961_s3 + $0x10] sm:$0xff] }
  0x1d   :  { %581 = vmatprep.subr.bf16.mxu0 %v580_v27  ;;  %604 = vmatprep.subr.bf16.mxu1 %v728_v61  ;;  %v730_v7 = vmov 0.0   ;;  %v296_v28 = vld [vmem:[%s961_s3] sm:$0xff]  ;;  %vm219_vm9 = vcmask 1041409   ;;  %v299_v35 = vld [vmem:[%s961_s3 + $0x18] sm:$0xff]  ;;  %v302_v41 = vld [vmem:[%s961_s3 + $0x30] sm:$0xff]  ;;  %vm399_vm11 = vcmask 33808  }
  0x1e   :  { %606 = vmatpush3.bf16.msra.mxu1 %v605_v60  ;;  %534 = vmatprep.mubr.msk.f32.mxu1 %vm729_vm6, %v730_v7  ;;  %v620_v37 = vpack.c.bf16 %v299_v35, %v298_v34  ;;  %v300_v38 = vld [vmem:[%s961_s3 + $0x20] sm:$0xff]  ;;  %vm387_vm12 = vcmask 9216   ;;  %vm410_vm13 = vcmask 17408   ;;  %vm416_vm14 = vcmask 15360  }
  0x1f   :  { %657 = vrot.lane.b32.xlu0 %v656_v26, %s727_s28  ;;  %607 = vmatprep.subr.bf16.mxu1 %v728_v61  ;;  %v438_v62 = vld [vmem:[%s963_s5 + $0x1] ss:$0 sm:$0xff]  ;;  %vm418_vm15 = vcmask 39936  }
  0x20   :  { %583 = vmatpush3.bf16.msra.mxu0 %v580_v27 }
  0x21   :  { %585 = vmatprep.subr.bf16.mxu0 %v584_v30 }
  0x22   :  { %609 = vmatpush3.bf16.msra.mxu1 %v608_v0 }
  0x23   :  { %610 = vmatprep.subr.bf16.mxu1 %v728_v61 }
  0x24   :  { %587 = vmatpush3.bf16.msra.mxu0 %v584_v30 }
  0x25   :  { %589 = vmatprep.subr.bf16.mxu0 %v588_v33 }
  0x28   :  { %591 = vmatpush3.bf16.msra.mxu0 %v588_v33  ;;  %v617_v33 = vpack.c.bf16 %v297_v29, %v296_v28 }
  0x29   :  { %593 = vmatprep.subr.bf16.mxu0 %v592_v36 }
  0x2c   :  { %595 = vmatpush3.bf16.msra.mxu0 %v592_v36 }
  0x2d   :  { %597 = vmatprep.subr.bf16.mxu0 %v596_v39 }
  0x30   :  { %599 = vmatpush3.bf16.msra.mxu0 %v596_v39  ;;  %v301_v39 = vld [vmem:[%s961_s3 + $0x28] sm:$0xff] }
  0x31   :  { %601 = vmatprep.subr.bf16.mxu0 %v600_v42  ;;  %v623_v40 = vpack.c.bf16 %v301_v39, %v300_v38 }
  0x34   :  { %603 = vmatpush3.bf16.msra.mxu0 %v600_v42  ;;  %v303_v42 = vld [vmem:[%s961_s3 + $0x38] sm:$0xff] }
  0x8d   :  { %v653_v43 = vpop.permute.xlu0 %652 }
  0x8e   :  { %v663_v44 = vpop.permute.xlu1 %662  ;;  %v655_v45 = vunpack.i.h.bf16 %v653_v43  ;;  %v654_v46 = vunpack.i.l.bf16 %v653_v43  ;;  %v626_v43 = vpack.c.bf16 %v303_v42, %v302_v41 }
  0x8f   :  { %v665_v48 = vunpack.i.h.bf16 %v663_v44  ;;  %v664_v49 = vunpack.i.l.bf16 %v663_v44  ;;  %v304_v44 = vld [vmem:[%s961_s3 + $0x40] sm:$0xff] }
  0x90   :  { %v82_v52 = vsel %vm81_vm3, %v780_v2, %v654_v46  ;;  %v83_v53 = vsel %vm81_vm3, %v782_v3, %v655_v45  ;;  %v209_v2 = vld [vmem:[%s960_s2 + $0x28] sm:$0xff] }
  0x91   :  { %v658_v47 = vpop.permute.xlu0 %657  ;;  %v611_v3 = vpack.c.bf16 %v209_v2, %v208_v1  ;;  %v305_v45 = vld [vmem:[%s961_s3 + $0x48] sm:$0xff] }
  0x92   :  { %v660_v50 = vunpack.i.h.bf16 %v658_v47  ;;  %v659_v51 = vunpack.i.l.bf16 %v658_v47  ;;  %v629_v46 = vpack.c.bf16 %v305_v45, %v304_v44  ;;  %v306_v47 = vld [vmem:[%s961_s3 + $0x50] sm:$0xff] }
  0x93   :  { %612 = vmatpush3.bf16.msra.mxu1 %v611_v3 }
  0x94   :  { %v85_v54 = vsel %vm84_vm4, %v82_v52, %v659_v51  ;;  %v86_v55 = vsel %vm84_vm4, %v83_v53, %v660_v50  ;;  %613 = vmatprep.subr.bf16.mxu1 %v728_v61  ;;  %v308_v50 = vld [vmem:[%s961_s3 + $0x60] sm:$0xff]  ;;  %v309_v51 = vld [vmem:[%s961_s3 + $0x68] sm:$0xff]  ;;  %v310_v53 = vld [vmem:[%s961_s3 + $0x70] sm:$0xff] }
  0x95   :  { %v88_v56 = vsel %vm87_vm5, %v85_v54, %v664_v49  ;;  %v89_v57 = vsel %vm87_vm5, %v86_v55, %v665_v48  ;;  %v307_v48 = vld [vmem:[%s961_s3 + $0x58] sm:$0xff]  ;;  %v635_v52 = vpack.c.bf16 %v309_v51, %v308_v50 }
  0x96   :  { %515 = vmatprep.mubr.f32.mxu0 %v88_v56  ;;  %v632_v49 = vpack.c.bf16 %v307_v48, %v306_v47  ;;  %v311_v54 = vld [vmem:[%s961_s3 + $0x78] sm:$0xff]  ;;  %v436_v56 = vld [vmem:[%s963_s5] ss:$0 sm:$0xff]  ;;  %s731_s3 = smov 126   ;;  %s732_s5 = smov [#allocation5]  }
  0x97   :  { %516 = vmatmul.mubr.f32.vlgmr.msra.gmra.mrb[0].mxu0 %v89_v57  ;;  %615 = vmatpush3.bf16.msra.mxu1 %v614_v6  ;;  %v638_v55 = vpack.c.bf16 %v311_v54, %v310_v53  ;;  %s427_s18 = sshll.u32 %s732_s5, 4  ;;  %s428_s18 = int_to_ptr.vmem [resolvable:$true] %s427_s18 }
  0x98   :  { %616 = vmatprep.subr.bf16.mxu1 %v728_v61  ;;  %s696_s19 = scalar_lea.vmem %s428_s18, 32  ;;  %p701_p9 = scmp.lt.s32.totalorder %s428_s18, %s428_s18 }
  0x99   :  { %p697_p8 = scmp.ne.s32.totalorder %s428_s18, %s696_s19  ;;  %p702_p10 = scmp.lt.s32.totalorder %s696_s19, %s696_s19 }
  0x9b   :  { %p703_p11 = por %p702_p10, %p701_p9 }
  0x9d   :  { %p704_p12 = pnand %p703_p11, %p697_p8 }
 0x16a   :  { %v517_v9 = vpop.f32.mrb[0].mxu0 }
 0x16b   :  { %v183_v10 = vadd.f32 %v517_v9, %v181_v8  ;;  %v172_v11 = vpop.f32.mrb[1].mxu0 }
 0x16c   :  { %v182_v12 = vadd.f32 %v181_v8, %v172_v11 }
 0x16d   :  { %vm185_vm7 = vcmp.ge.f32.partialorder %v183_v10, 0.0  ;;  %v187_v13 = vmul.f32 0.01, %v183_v10 }
 0x16e   :  { %vm184_vm8 = vcmp.ge.f32.partialorder %v182_v12, 0.0  ;;  %v186_v14 = vmul.f32 0.01, %v182_v12 }
 0x16f   :  { %v189_v15 = vsel %vm185_vm7, %v183_v10, %v187_v13 }
 0x170   :  { %v197_v16 = vsel %vm84_vm4, %v189_v15, -inf  ;;  %v188_v17 = vsel %vm184_vm8, %v182_v12, %v186_v14 }
 0x171   :  { %v198_v18 = vrot.slane %v197_v16, 4  ;;  %v190_v19 = vsel %vm84_vm4, %v188_v17, -inf }
 0x172   :  { %v191_v20 = vrot.slane %v190_v19, 4 }
 0x173   :  { %v199_v21 = vmax.f32 %v197_v16, %v198_v18 }
 0x174   :  { %v192_v22 = vmax.f32 %v190_v19, %v191_v20 }
 0x175   :  { %v200_v23 = vrot.slane %v199_v21, 2 }
 0x176   :  { %v193_v24 = vrot.slane %v192_v22, 2 }
 0x177   :  { %v201_v25 = vmax.f32 %v199_v21, %v200_v23 }
 0x178   :  { %v194_v26 = vmax.f32 %v192_v22, %v193_v24 }
 0x179   :  { %v202_v27 = vrot.slane %v201_v25, 1 }
 0x17a   :  { %v195_v30 = vrot.slane %v194_v26, 1 }
 0x17b   :  { %v203_v31 = vmax.f32 %v201_v25, %v202_v27 }
 0x17c   :  { %v196_v32 = vmax.f32 %v194_v26, %v195_v30 }
 0x17e   :  { %v220_v36 = vsel %vm219_vm9, %v203_v31, %v196_v32 }
 0x17f   :  { %535 = vmatmul.mubr.msk.f32.vlgmr.msra.gmra.mrb[0].mxu1 %vm84_vm4, %v220_v36 }
 0x180   :  { %618 = vmatpush3.bf16.msra.mxu1 %v617_v33  ;;  %569 = vmatprep.mubr.msk.f32.mxu1 %vm729_vm6, %v730_v7 }
 0x181   :  { %619 = vmatprep.subr.bf16.mxu1 %v728_v61 }
 0x184   :  { %621 = vmatpush3.bf16.msra.mxu1 %v620_v37 }
 0x185   :  { %622 = vmatprep.subr.bf16.mxu1 %v728_v61 }
 0x188   :  { %624 = vmatpush3.bf16.msra.mxu1 %v623_v40 }
 0x189   :  { %625 = vmatprep.subr.bf16.mxu1 %v728_v61 }
 0x18c   :  { %627 = vmatpush3.bf16.msra.mxu1 %v626_v43 }
 0x18d   :  { %628 = vmatprep.subr.bf16.mxu1 %v728_v61 }
 0x190   :  { %630 = vmatpush3.bf16.msra.mxu1 %v629_v46 }
 0x191   :  { %631 = vmatprep.subr.bf16.mxu1 %v728_v61 }
 0x194   :  { %633 = vmatpush3.bf16.msra.mxu1 %v632_v49 }
 0x195   :  { %634 = vmatprep.subr.bf16.mxu1 %v728_v61 }
 0x198   :  { %636 = vmatpush3.bf16.msra.mxu1 %v635_v52 }
 0x199   :  { %637 = vmatprep.subr.bf16.mxu1 %v728_v61 }
 0x19c   :  { %639 = vmatpush3.bf16.msra.mxu1 %v638_v55 }
 0x252   :  { %v289_v57 = vpop.f32.mrb[0].mxu1 }
 0x253   :  { %v290_v58 = vadd.f32 %v436_v56, %v289_v57  ;;  %v536_v59 = vpop.f32.mrb[1].mxu1 }
 0x255   :  { %vm293_vm10 = vcmp.ge.f32.partialorder %v290_v58, 0.0  ;;  %v294_v60 = vmul.f32 0.01, %v290_v58 }
 0x257   :  { %v295_v61 = vsel %vm293_vm10, %v290_v58, %v294_v60 }
 0x258   :  { %570 = vmatmul.mubr.f32.vlgmr.msra.gmra.mrb[2].mxu1 %v295_v61 }
 0x32b   :  { %v383_v63 = vpop.f32.mrb[2].mxu1 }
 0x32c   :  { %v384_v0 = vadd.f32 %v438_v62, %v383_v63  ;;  %v571_v1 = vpop.f32.mrb[3].mxu1 }
 0x32e   :  { %v400_v2 = vsel %vm399_vm11, %v384_v0, -inf  ;;  %v388_v3 = vsel %vm387_vm12, %v384_v0, -inf }
 0x32f   :  { %401 = vmax.xlane.f32.xlu1 %v400_v2  ;;  %389 = vmax.xlane.f32.xlu0 %v388_v3 }
 0x3bc   :  { %v402_v4 = vpop.xlane.xlu1 %401  ;;  %v390_v5 = vpop.xlane.xlu0 %389 }
 0x3bd   :  { %v403_v6 = vsub.f32 %v384_v0, %v402_v4  ;;  %v391_v7 = vsub.f32 %v384_v0, %v390_v5 }
 0x3bf   :  { %v404_v8 = vmul.f32 1.442695, %v403_v6  ;;  %v392_v9 = vmul.f32 1.442695, %v391_v7 }
 0x3c1   :  { %666 = vpow2.f32 %v404_v8 }
 0x3c2   :  { %668 = vpow2.f32 %v392_v9 }
 0x3cb   :  { %v667_v10 = vpop.eup %666 }
 0x3cc   :  { %v669_v11 = vpop.eup %668  ;;  %407 = vrot.lane.b32.xlu0 %v667_v10, %s731_s3 }
 0x3cd   :  { %v394_v12 = vsel %vm387_vm12, %v669_v11, 0.0 }
 0x3ce   :  { %395 = vadd.xlane.f32.xlu1 %v394_v12 }
 0x43e   :  { %v408_v13 = vpop.permute.xlu0 %407 }
 0x43f   :  { %v411_v14 = vsel %vm410_vm13, %v408_v13, 0.0 }
 0x440   :  { %412 = vadd.xlane.f32.xlu1 %v411_v14 }
 0x45b   :  { %v396_v15 = vpop.xlane.xlu1 %395 }
 0x45c   :  { %670 = vrcp.f32 %v396_v15 }
 0x466   :  { %v671_v17 = vpop.eup %670 }
 0x467   :  { %v398_v19 = vmul.f32 %v671_v17, %v669_v11 }
 0x4cd   :  { %v413_v16 = vpop.xlane.xlu1 %412 }
 0x4ce   :  { %672 = vrcp.f32 %v413_v16 }
 0x4d8   :  { %v673_v18 = vpop.eup %672 }
 0x4d9   :  { %v415_v20 = vmul.f32 %v673_v18, %v667_v10 }
 0x4db   :  { %v417_v21 = vsel %vm416_vm14, %v398_v19, %v415_v20 }
 0x4dc   :  { %v419_v22 = vsel %vm418_vm15, %v417_v21, 0.0 }
 0x4dd   :  { %420 = vst [vmem:[#allocation5] sm:$0x3] %v419_v22 }
 0x4de   :  { %707 = shalt.err (!%p704_p12)
}
 0x4df   :  { %s708_s21 = scalar_lea.hbm %s964_s6, 32 }
 0x4e0   :  { %p709_p13 = scmp.ne.s32.totalorder %s964_s6, %s708_s21  ;;  %p712_p0 = scmp.lt.u32.totalorder %s708_s21, %s964_s6 }
 0x4e2   :  { %p714_p1 = pnand %p712_p0, %p709_p13 }
 0x4e4   :  { %717 = shalt.err (!%p714_p1)
}
 0x4e5   :  { %430 = dma.vmem_to_hbm [thread:$0]  %s428_s18, 32, %s964_s6, [#allocation4]  }
 0x4e6   :  { %720 = dma.done.wait [#allocation4], 32  }
 0x4e7   :  { %721 = vsyncadd [#allocation4], 4294967264 }
 0x4e8   :  { %434 = vsyncpa [#allocation3], 1 }
 0x4e9   :  { %435 = vsyncpa [#allocation4], 1 }

</bundles_post_ra>
